<compile_context>
chip_gen: v5e
topology: v5e:2x2
jax: 0.10.0
libtpu: 0.0.40
codegen_flags: <defaults>
</compile_context>

<pallas_src>
import functools

import jax
import jax.numpy as jnp
from jax.experimental import pallas as pl
from jax.experimental.pallas import tpu as pltpu


# ----------------------------------------------------------------------------
# Fused kernel: [masked conv3x3 + ReLU] x2  ->  GAP  ->  FC head  (one image)
# ----------------------------------------------------------------------------
def fused_net_kernel(x_ref,
                     w1_ref, fmt1_ref, bt1_ref, mt1_ref,
                     w2_ref, fmt2_ref, bt2_ref, mt2_ref,
                     wg_ref, bfc_ref,
                     o_ref,
                     ap1, ap2,
                     *, H, KH):
    # x_ref   : (H, W*C0)                 f32   lane-dense input row-slab
    # w{l}_ref: (KH, W*Cin_l, W*Cout_l)   bf16  banded conv weights (kw taps +
    #                                           'same' zero padding folded in)
    # fmt/bt/mt: (1, W*Cin) / (1, W*Cout) f32   W-tiled front-mask / bias / mask
    # wg_ref  : (W*C2, OUTP)              bf16  GAP(1/HW)-scaled W-tiled FC slab
    # bfc_ref : (1, OUTP)                 f32
    # o_ref   : (1, OUTP)                 f32   lane-dense padded logits
    # ap{l}   : (H+KH-1, W*Cin_l)         f32   vertically padded activation
    halo = KH // 2

    def masked_conv_relu(x_val, ap, w_ref, fmt_ref, bt_ref, mt_ref):
        cols = ap.shape[1]
        # Halo-only zero fill: just the two vertical border rows (the 'same'
        # padding along W is already zero columns inside the banded weights).
        ap[0:halo, :] = jnp.zeros((halo, cols), jnp.float32)
        ap[H + halo:H + 2 * halo, :] = jnp.zeros((halo, cols), jnp.float32)
        # Conv2dMask front mask: applied ONCE, fused into the interior fill.
        ap[halo:halo + H, :] = x_val * fmt_ref[...]

        # KH lane-dense matmuls (one per kernel row, sublane-shifted reads);
        # bf16 operands cast right before the dot, f32 accumulate.
        acc = jnp.dot(ap[0:H, :].astype(w_ref.dtype), w_ref[0],
                      preferred_element_type=jnp.float32)
        for kh in range(1, KH):
            acc += jnp.dot(ap[kh:kh + H, :].astype(w_ref.dtype), w_ref[kh],
                           preferred_element_type=jnp.float32)

        # Conv2dMask output mask + bias, applied ONCE, fused with the ReLU:
        #   m * (conv(fm*x, w) + b) == conv(x, w*m*fm) + b*m   (exact, linear)
        return jnp.maximum((acc + bt_ref[...]) * mt_ref[...], 0.0)

    h1 = masked_conv_relu(x_ref[...], ap1, w1_ref, fmt1_ref, bt1_ref, mt1_ref)
    h2 = masked_conv_relu(h1, ap2, w2_ref, fmt2_ref, bt2_ref, mt2_ref)

    # Global average pool folded into the FC head: sublane reduce over H (XLU),
    # then one lane-dense (1, W*C2) x (W*C2, 128) matmul against w_fc/HW tiled
    # over W.  Output slab stays 128-lane dense; wrapper slices to num_classes.
    pooled = jnp.sum(h2, axis=0, keepdims=True)                 # (1, W*C2) f32
    o_ref[...] = (jnp.dot(pooled.astype(wg_ref.dtype), wg_ref[...],
                          preferred_element_type=jnp.float32) + bfc_ref[...])


def net_with_mask_forward(params, masks, x_nchw, *, out_pad=128,
                          mm_dtype=jnp.bfloat16):
    """Fused NetWithMask forward.  x_nchw: (N, Cin, H, W), PyTorch convention."""
    # TODO(synk): full VGG/ResNet stacks (BatchNorm, maxpool towers, pretrained
    # checkpoints, prune()/deepcopy rebuild) are not reproduced; this mini-net
    # exercises the Conv2dMask masked-conv hot path exactly.
    # TODO(synk): at real VGG spatial sizes, additionally grid over row strips
    # (1-row halo carried through the ap scratch, front mask folded into the
    # strip fill) and re-derive tile sizes against v7x's 64 MiB VMEM.
    x = jnp.transpose(x_nchw, (0, 2, 3, 1)).astype(jnp.float32)   # NCHW -> NHWC
    N, H, W, C0 = x.shape
    KH, KW, _, C1 = params["w1"].shape
    C2 = params["w2"].shape[3]
    num_classes = params["w_fc"].shape[1]
    x2d = x.reshape(N, H, W * C0)              # lane-dense (H, W*C0) row-slab

    # ---- pure layout glue (no mask math): banded conv weights --------------
    # band(w)[kh, win*Cin+ci, w*Cout+co] = w[kh, win-w+1, ci, co] when the tap
    # is in range, else 0 -> horizontal taps + 'same' zero padding become zero
    # entries, so each conv is KH matmuls (H, W*Cin) @ (W*Cin, W*Cout).
    def band(w):
        kh_, kw_, cin, cout = w.shape
        r = jnp.arange(W)
        sel = (r[None, :, None] ==
               r[None, None, :] + jnp.arange(kw_)[:, None, None] - (kw_ // 2))
        m = jnp.einsum("hkio,krw->hriwo", w, sel.astype(w.dtype))
        return m.reshape(kh_, W * cin, W * cout).astype(mm_dtype)

    def tile_w(v):                             # (C,) -> (1, W*C), w-major c-minor
        return jnp.tile(v.astype(jnp.float32), W).reshape(1, W * v.shape[0])

    w1b, w2b = band(params["w1"]), band(params["w2"])
    fmt1, bt1, mt1 = tile_w(masks[0]), tile_w(params["b1"]), tile_w(masks[1])
    fmt2, bt2, mt2 = tile_w(masks[1]), tile_w(params["b2"]), tile_w(masks[2])

    # GAP folded into the FC head: (w_fc / HW) tiled over W, lane-padded to 128.
    wg = jnp.zeros((W * C2, out_pad), jnp.float32)
    wg = wg.at[:, :num_classes].set(jnp.tile(params["w_fc"], (W, 1)) / (H * W))
    wg = wg.astype(mm_dtype)
    bfc = jnp.zeros((1, out_pad), jnp.float32).at[0, :num_classes].set(params["b_fc"])

    kernel = functools.partial(fused_net_kernel, H=H, KH=KH)
    logits_pad = pl.pallas_call(
        kernel,
        out_shape=jax.ShapeDtypeStruct((N, 1, out_pad), jnp.float32),
        grid=(N,),
        in_specs=[
            pl.BlockSpec((None, H, W * C0), lambda i: (i, 0, 0)),
            pl.BlockSpec((KH, W * C0, W * C1), lambda i: (0, 0, 0)),
            pl.BlockSpec((1, W * C0), lambda i: (0, 0)),
            pl.BlockSpec((1, W * C1), lambda i: (0, 0)),
            pl.BlockSpec((1, W * C1), lambda i: (0, 0)),
            pl.BlockSpec((KH, W * C1, W * C2), lambda i: (0, 0, 0)),
            pl.BlockSpec((1, W * C1), lambda i: (0, 0)),
            pl.BlockSpec((1, W * C2), lambda i: (0, 0)),
            pl.BlockSpec((1, W * C2), lambda i: (0, 0)),
            pl.BlockSpec((W * C2, out_pad), lambda i: (0, 0)),
            pl.BlockSpec((1, out_pad), lambda i: (0, 0)),
        ],
        out_specs=pl.BlockSpec((None, 1, out_pad), lambda i: (i, 0, 0)),
        scratch_shapes=[
            pltpu.VMEM((H + KH - 1, W * C0), jnp.float32),   # ap1 (halo rows)
            pltpu.VMEM((H + KH - 1, W * C1), jnp.float32),   # ap2 (halo rows)
        ],
        compiler_params=pltpu.CompilerParams(
            dimension_semantics=("parallel",),   # v7x: 2 TCs split the batch
            vmem_limit_bytes=32 * 1024 * 1024),
    )(x2d, w1b, fmt1, bt1, mt1, w2b, fmt2, bt2, mt2, wg, bfc)
    return logits_pad.reshape(N, out_pad)[:, :num_classes]


# ----------------------------------------------------------------------------
# NetWithMask: deterministic params, mask list (mask[0] = ones(3)), mask_filters
# ----------------------------------------------------------------------------
def init_net_with_mask(key, in_ch=3, c1=8, c2=16, num_classes=10):
    k1, k2, k3 = jax.random.split(key, 3)
    params = {
        # stored in (KH, KW, Cin, Cout) layout (transposed PyTorch convention)
        "w1": 0.1 * jax.random.normal(k1, (3, 3, in_ch, c1), jnp.float32),
        "b1": jnp.linspace(-0.1, 0.1, c1, dtype=jnp.float32),
        "w2": 0.1 * jax.random.normal(k2, (3, 3, c1, c2), jnp.float32),
        "b2": jnp.linspace(-0.1, 0.1, c2, dtype=jnp.float32),
        "w_fc": 0.1 * jax.random.normal(k3, (c2, num_classes), jnp.float32),
        "b_fc": jnp.zeros((num_classes,), jnp.float32),
    }
    # self.mask = [ones(3)] + [ones(out_channels) per conv layer]
    masks = [jnp.ones((in_ch,), jnp.float32),
             jnp.ones((c1,), jnp.float32),
             jnp.ones((c2,), jnp.float32)]
    return params, masks


def mask_filters(masks, layer_index, filter_index):
    """NetWithMask.mask_filters: zero a filter's mask (layer_index starts at 0)."""
    m = list(masks)
    m[layer_index + 1] = m[layer_index + 1].at[filter_index].set(0.0)
    return m


# ----------------------------------------------------------------------------
# Pure-JAX reference of the same forward (for correctness check)
# ----------------------------------------------------------------------------
def _ref_forward(params, masks, x_nchw):
    x = jnp.transpose(x_nchw, (0, 2, 3, 1)).astype(jnp.float32)

    def conv(x, w, b, m, fm):
        wm = w * fm[None, None, :, None] * m[None, None, None, :]
        out = jax.lax.conv_general_dilated(
            x, wm, window_strides=(1, 1), padding="SAME",
            dimension_numbers=("NHWC", "HWIO", "NHWC"))
        return jnp.maximum(out + (b * m)[None, None, None, :], 0.0)

    h = conv(x, params["w1"], params["b1"], masks[1], masks[0])
    h = conv(h, params["w2"], params["b2"], masks[2], masks[1])
    pooled = jnp.mean(h, axis=(1, 2))
    return pooled @ params["w_fc"] + params["b_fc"]


if __name__ == "__main__":
    key = jax.random.PRNGKey(0)
    kx, kp = jax.random.split(key)

    # PyTorch-convention input: NCHW, batch=2, channels=3 (RGB), 16x16 spatial
    x = jax.random.normal(kx, (2, 3, 16, 16), jnp.float32)

    params, masks = init_net_with_mask(kp)
    # exercise the pruning-by-mask path: prune filter 2 of conv layer 0
    masks = mask_filters(masks, layer_index=0, filter_index=2)

    out = jax.block_until_ready(net_with_mask_forward(params, masks, x))
    ref = _ref_forward(params, masks, x)

    assert out.shape == (2, 10)
    err = jnp.max(jnp.abs(out - ref))
    # bf16 MXU operands with f32 accumulation -> relaxed tolerance vs f32 ref.
    assert jnp.allclose(out, ref, atol=1e-2, rtol=1e-2), f"max err {err}"
    print("KERNEL_OK")
</pallas_src>

<mosaic_0001>
module attributes {stable_mosaic.version = 11 : i64} {
  func.func @fused_net_kernel(%arg0: i32, %arg1: memref<1x16x48xf32, #tpu.memory_space<vmem>>, %arg2: memref<3x48x128xbf16, #tpu.memory_space<vmem>>, %arg3: memref<1x48xf32, #tpu.memory_space<vmem>>, %arg4: memref<1x128xf32, #tpu.memory_space<vmem>>, %arg5: memref<1x128xf32, #tpu.memory_space<vmem>>, %arg6: memref<3x128x256xbf16, #tpu.memory_space<vmem>>, %arg7: memref<1x128xf32, #tpu.memory_space<vmem>>, %arg8: memref<1x256xf32, #tpu.memory_space<vmem>>, %arg9: memref<1x256xf32, #tpu.memory_space<vmem>>, %arg10: memref<256x128xbf16, #tpu.memory_space<vmem>>, %arg11: memref<1x128xf32, #tpu.memory_space<vmem>>, %arg12: memref<1x1x128xf32, #tpu.memory_space<vmem>>, %arg13: memref<18x48xf32, #tpu.memory_space<vmem>>, %arg14: memref<18x128xf32, #tpu.memory_space<vmem>>) attributes {dimension_semantics = [#tpu.dimension_semantics<parallel>], iteration_bounds = array<i64: 2>, scalar_prefetch = 0 : i64, scratch_operands = 2 : i64, tpu.core_type = #tpu.core_type<tc>, window_params = [{transform_indices = @transform_0, window_bounds = array<i64: 1, 16, 48>}, {pipeline_mode = #tpu.pipeline_mode<synchronous>, transform_indices = @transform_1, window_bounds = array<i64: 3, 48, 128>}, {pipeline_mode = #tpu.pipeline_mode<synchronous>, transform_indices = @transform_2, window_bounds = array<i64: 1, 48>}, {pipeline_mode = #tpu.pipeline_mode<synchronous>, transform_indices = @transform_3, window_bounds = array<i64: 1, 128>}, {pipeline_mode = #tpu.pipeline_mode<synchronous>, transform_indices = @transform_4, window_bounds = array<i64: 1, 128>}, {pipeline_mode = #tpu.pipeline_mode<synchronous>, transform_indices = @transform_5, window_bounds = array<i64: 3, 128, 256>}, {pipeline_mode = #tpu.pipeline_mode<synchronous>, transform_indices = @transform_6, window_bounds = array<i64: 1, 128>}, {pipeline_mode = #tpu.pipeline_mode<synchronous>, transform_indices = @transform_7, window_bounds = array<i64: 1, 256>}, {pipeline_mode = #tpu.pipeline_mode<synchronous>, transform_indices = @transform_8, window_bounds = array<i64: 1, 256>}, {pipeline_mode = #tpu.pipeline_mode<synchronous>, transform_indices = @transform_9, window_bounds = array<i64: 256, 128>}, {pipeline_mode = #tpu.pipeline_mode<synchronous>, transform_indices = @transform_10, window_bounds = array<i64: 1, 128>}, {transform_indices = @transform_11, window_bounds = array<i64: 1, 1, 128>}]} {
    %c0 = arith.constant 0 : index
    %c0_0 = arith.constant 0 : index
    %c0_1 = arith.constant 0 : index
    %0 = vector.load %arg1[%c0, %c0_0, %c0_1] : memref<1x16x48xf32, #tpu.memory_space<vmem>>, vector<1x16x48xf32>
    %1 = vector.shape_cast %0 : vector<1x16x48xf32> to vector<16x48xf32>
    %cst = arith.constant 0.000000e+00 : f32
    %2 = vector.broadcast %cst : f32 to vector<1x48xf32>
    %c0_2 = arith.constant 0 : index
    %c0_3 = arith.constant 0 : index
    %3 = vector.load %arg13[%c0_2, %c0_3] : memref<18x48xf32, #tpu.memory_space<vmem>>, vector<1x48xf32>
    tpu.vector_store %arg13[%c0_2, %c0_3], %2 {strides = array<i32>} : memref<18x48xf32, #tpu.memory_space<vmem>>, vector<1x48xf32>,
    %cst_4 = arith.constant 0.000000e+00 : f32
    %4 = vector.broadcast %cst_4 : f32 to vector<1x48xf32>
    %c17 = arith.constant 17 : index
    %c0_5 = arith.constant 0 : index
    %5 = vector.load %arg13[%c17, %c0_5] : memref<18x48xf32, #tpu.memory_space<vmem>>, vector<1x48xf32>
    tpu.vector_store %arg13[%c17, %c0_5], %4 {strides = array<i32>} : memref<18x48xf32, #tpu.memory_space<vmem>>, vector<1x48xf32>,
    %c0_6 = arith.constant 0 : index
    %c0_7 = arith.constant 0 : index
    %6 = vector.load %arg3[%c0_6, %c0_7] : memref<1x48xf32, #tpu.memory_space<vmem>>, vector<1x48xf32>
    %7 = vector.broadcast %6 : vector<1x48xf32> to vector<16x48xf32>
    %8 = arith.mulf %1, %7 : vector<16x48xf32>
    %c1 = arith.constant 1 : index
    %c0_8 = arith.constant 0 : index
    %9 = vector.load %arg13[%c1, %c0_8] : memref<18x48xf32, #tpu.memory_space<vmem>>, vector<16x48xf32>
    tpu.vector_store %arg13[%c1, %c0_8], %8 {strides = array<i32>} : memref<18x48xf32, #tpu.memory_space<vmem>>, vector<16x48xf32>,
    %c0_9 = arith.constant 0 : index
    %c0_10 = arith.constant 0 : index
    %10 = vector.load %arg13[%c0_9, %c0_10] : memref<18x48xf32, #tpu.memory_space<vmem>>, vector<16x48xf32>
    %11 = arith.truncf %10 : vector<16x48xf32> to vector<16x48xbf16>
    %c0_11 = arith.constant 0 : index
    %c0_12 = arith.constant 0 : index
    %c0_13 = arith.constant 0 : index
    %12 = vector.load %arg2[%c0_11, %c0_12, %c0_13] : memref<3x48x128xbf16, #tpu.memory_space<vmem>>, vector<1x48x128xbf16>
    %13 = vector.shape_cast %12 : vector<1x48x128xbf16> to vector<48x128xbf16>
    %cst_14 = arith.constant dense<0.000000e+00> : vector<16x128xf32>
    %14 = tpu.matmul %11, %13, %cst_14 {dimension_numbers = #tpu.dot_dimension_numbers<[1], [0], [0], [1], [0, 0, 1, 1], [], []>} : vector<16x48xbf16>, vector<48x128xbf16>, vector<16x128xf32> -> vector<16x128xf32>
    %c1_15 = arith.constant 1 : index
    %c0_16 = arith.constant 0 : index
    %15 = vector.load %arg13[%c1_15, %c0_16] : memref<18x48xf32, #tpu.memory_space<vmem>>, vector<16x48xf32>
    %16 = arith.truncf %15 : vector<16x48xf32> to vector<16x48xbf16>
    %c1_17 = arith.constant 1 : index
    %c0_18 = arith.constant 0 : index
    %c0_19 = arith.constant 0 : index
    %17 = vector.load %arg2[%c1_17, %c0_18, %c0_19] : memref<3x48x128xbf16, #tpu.memory_space<vmem>>, vector<1x48x128xbf16>
    %18 = vector.shape_cast %17 : vector<1x48x128xbf16> to vector<48x128xbf16>
    %cst_20 = arith.constant dense<0.000000e+00> : vector<16x128xf32>
    %19 = tpu.matmul %16, %18, %cst_20 {dimension_numbers = #tpu.dot_dimension_numbers<[1], [0], [0], [1], [0, 0, 1, 1], [], []>} : vector<16x48xbf16>, vector<48x128xbf16>, vector<16x128xf32> -> vector<16x128xf32>
    %20 = arith.addf %14, %19 : vector<16x128xf32>
    %c2 = arith.constant 2 : index
    %c0_21 = arith.constant 0 : index
    %21 = vector.load %arg13[%c2, %c0_21] : memref<18x48xf32, #tpu.memory_space<vmem>>, vector<16x48xf32>
    %22 = arith.truncf %21 : vector<16x48xf32> to vector<16x48xbf16>
    %c2_22 = arith.constant 2 : index
    %c0_23 = arith.constant 0 : index
    %c0_24 = arith.constant 0 : index
    %23 = vector.load %arg2[%c2_22, %c0_23, %c0_24] : memref<3x48x128xbf16, #tpu.memory_space<vmem>>, vector<1x48x128xbf16>
    %24 = vector.shape_cast %23 : vector<1x48x128xbf16> to vector<48x128xbf16>
    %cst_25 = arith.constant dense<0.000000e+00> : vector<16x128xf32>
    %25 = tpu.matmul %22, %24, %cst_25 {dimension_numbers = #tpu.dot_dimension_numbers<[1], [0], [0], [1], [0, 0, 1, 1], [], []>} : vector<16x48xbf16>, vector<48x128xbf16>, vector<16x128xf32> -> vector<16x128xf32>
    %26 = arith.addf %20, %25 : vector<16x128xf32>
    %c0_26 = arith.constant 0 : index
    %c0_27 = arith.constant 0 : index
    %27 = vector.load %arg4[%c0_26, %c0_27] : memref<1x128xf32, #tpu.memory_space<vmem>>, vector<1x128xf32>
    %28 = vector.broadcast %27 : vector<1x128xf32> to vector<16x128xf32>
    %29 = arith.addf %26, %28 : vector<16x128xf32>
    %c0_28 = arith.constant 0 : index
    %c0_29 = arith.constant 0 : index
    %30 = vector.load %arg5[%c0_28, %c0_29] : memref<1x128xf32, #tpu.memory_space<vmem>>, vector<1x128xf32>
    %31 = vector.broadcast %30 : vector<1x128xf32> to vector<16x128xf32>
    %32 = arith.mulf %29, %31 : vector<16x128xf32>
    %cst_30 = arith.constant 0.000000e+00 : f32
    %33 = vector.broadcast %cst_30 : f32 to vector<16x128xf32>
    %34 = arith.maximumf %32, %33 : vector<16x128xf32>
    %cst_31 = arith.constant 0.000000e+00 : f32
    %35 = vector.broadcast %cst_31 : f32 to vector<1x128xf32>
    %c0_32 = arith.constant 0 : index
    %c0_33 = arith.constant 0 : index
    %36 = vector.load %arg14[%c0_32, %c0_33] : memref<18x128xf32, #tpu.memory_space<vmem>>, vector<1x128xf32>
    tpu.vector_store %arg14[%c0_32, %c0_33], %35 {strides = array<i32>} : memref<18x128xf32, #tpu.memory_space<vmem>>, vector<1x128xf32>,
    %cst_34 = arith.constant 0.000000e+00 : f32
    %37 = vector.broadcast %cst_34 : f32 to vector<1x128xf32>
    %c17_35 = arith.constant 17 : index
    %c0_36 = arith.constant 0 : index
    %38 = vector.load %arg14[%c17_35, %c0_36] : memref<18x128xf32, #tpu.memory_space<vmem>>, vector<1x128xf32>
    tpu.vector_store %arg14[%c17_35, %c0_36], %37 {strides = array<i32>} : memref<18x128xf32, #tpu.memory_space<vmem>>, vector<1x128xf32>,
    %c0_37 = arith.constant 0 : index
    %c0_38 = arith.constant 0 : index
    %39 = vector.load %arg7[%c0_37, %c0_38] : memref<1x128xf32, #tpu.memory_space<vmem>>, vector<1x128xf32>
    %40 = vector.broadcast %39 : vector<1x128xf32> to vector<16x128xf32>
    %41 = arith.mulf %34, %40 : vector<16x128xf32>
    %c1_39 = arith.constant 1 : index
    %c0_40 = arith.constant 0 : index
    %42 = vector.load %arg14[%c1_39, %c0_40] : memref<18x128xf32, #tpu.memory_space<vmem>>, vector<16x128xf32>
    tpu.vector_store %arg14[%c1_39, %c0_40], %41 {strides = array<i32>} : memref<18x128xf32, #tpu.memory_space<vmem>>, vector<16x128xf32>,
    %c0_41 = arith.constant 0 : index
    %c0_42 = arith.constant 0 : index
    %43 = vector.load %arg14[%c0_41, %c0_42] : memref<18x128xf32, #tpu.memory_space<vmem>>, vector<16x128xf32>
    %44 = arith.truncf %43 : vector<16x128xf32> to vector<16x128xbf16>
    %c0_43 = arith.constant 0 : index
    %c0_44 = arith.constant 0 : index
    %c0_45 = arith.constant 0 : index
    %45 = vector.load %arg6[%c0_43, %c0_44, %c0_45] : memref<3x128x256xbf16, #tpu.memory_space<vmem>>, vector<1x128x256xbf16>
    %46 = vector.shape_cast %45 : vector<1x128x256xbf16> to vector<128x256xbf16>
    %cst_46 = arith.constant dense<0.000000e+00> : vector<16x256xf32>
    %47 = tpu.matmul %44, %46, %cst_46 {dimension_numbers = #tpu.dot_dimension_numbers<[1], [0], [0], [1], [0, 0, 1, 1], [], []>} : vector<16x128xbf16>, vector<128x256xbf16>, vector<16x256xf32> -> vector<16x256xf32>
    %c1_47 = arith.constant 1 : index
    %c0_48 = arith.constant 0 : index
    %48 = vector.load %arg14[%c1_47, %c0_48] : memref<18x128xf32, #tpu.memory_space<vmem>>, vector<16x128xf32>
    %49 = arith.truncf %48 : vector<16x128xf32> to vector<16x128xbf16>
    %c1_49 = arith.constant 1 : index
    %c0_50 = arith.constant 0 : index
    %c0_51 = arith.constant 0 : index
    %50 = vector.load %arg6[%c1_49, %c0_50, %c0_51] : memref<3x128x256xbf16, #tpu.memory_space<vmem>>, vector<1x128x256xbf16>
    %51 = vector.shape_cast %50 : vector<1x128x256xbf16> to vector<128x256xbf16>
    %cst_52 = arith.constant dense<0.000000e+00> : vector<16x256xf32>
    %52 = tpu.matmul %49, %51, %cst_52 {dimension_numbers = #tpu.dot_dimension_numbers<[1], [0], [0], [1], [0, 0, 1, 1], [], []>} : vector<16x128xbf16>, vector<128x256xbf16>, vector<16x256xf32> -> vector<16x256xf32>
    %53 = arith.addf %47, %52 : vector<16x256xf32>
    %c2_53 = arith.constant 2 : index
    %c0_54 = arith.constant 0 : index
    %54 = vector.load %arg14[%c2_53, %c0_54] : memref<18x128xf32, #tpu.memory_space<vmem>>, vector<16x128xf32>
    %55 = arith.truncf %54 : vector<16x128xf32> to vector<16x128xbf16>
    %c2_55 = arith.constant 2 : index
    %c0_56 = arith.constant 0 : index
    %c0_57 = arith.constant 0 : index
    %56 = vector.load %arg6[%c2_55, %c0_56, %c0_57] : memref<3x128x256xbf16, #tpu.memory_space<vmem>>, vector<1x128x256xbf16>
    %57 = vector.shape_cast %56 : vector<1x128x256xbf16> to vector<128x256xbf16>
    %cst_58 = arith.constant dense<0.000000e+00> : vector<16x256xf32>
    %58 = tpu.matmul %55, %57, %cst_58 {dimension_numbers = #tpu.dot_dimension_numbers<[1], [0], [0], [1], [0, 0, 1, 1], [], []>} : vector<16x128xbf16>, vector<128x256xbf16>, vector<16x256xf32> -> vector<16x256xf32>
    %59 = arith.addf %53, %58 : vector<16x256xf32>
    %c0_59 = arith.constant 0 : index
    %c0_60 = arith.constant 0 : index
    %60 = vector.load %arg8[%c0_59, %c0_60] : memref<1x256xf32, #tpu.memory_space<vmem>>, vector<1x256xf32>
    %61 = vector.broadcast %60 : vector<1x256xf32> to vector<16x256xf32>
    %62 = arith.addf %59, %61 : vector<16x256xf32>
    %c0_61 = arith.constant 0 : index
    %c0_62 = arith.constant 0 : index
    %63 = vector.load %arg9[%c0_61, %c0_62] : memref<1x256xf32, #tpu.memory_space<vmem>>, vector<1x256xf32>
    %64 = vector.broadcast %63 : vector<1x256xf32> to vector<16x256xf32>
    %65 = arith.mulf %62, %64 : vector<16x256xf32>
    %cst_63 = arith.constant 0.000000e+00 : f32
    %66 = vector.broadcast %cst_63 : f32 to vector<16x256xf32>
    %67 = arith.maximumf %65, %66 : vector<16x256xf32>
    %cst_64 = arith.constant dense<0.000000e+00> : vector<256xf32>
    %68 = vector.multi_reduction <add>, %67, %cst_64 [0] : vector<16x256xf32> to vector<256xf32>
    %69 = vector.shape_cast %68 : vector<256xf32> to vector<1x256xf32>
    %70 = arith.truncf %69 : vector<1x256xf32> to vector<1x256xbf16>
    %c0_65 = arith.constant 0 : index
    %c0_66 = arith.constant 0 : index
    %71 = vector.load %arg10[%c0_65, %c0_66] : memref<256x128xbf16, #tpu.memory_space<vmem>>, vector<256x128xbf16>
    %cst_67 = arith.constant dense<0.000000e+00> : vector<1x128xf32>
    %72 = tpu.matmul %70, %71, %cst_67 {dimension_numbers = #tpu.dot_dimension_numbers<[1], [0], [0], [1], [0, 0, 1, 1], [], []>} : vector<1x256xbf16>, vector<256x128xbf16>, vector<1x128xf32> -> vector<1x128xf32>
    %c0_68 = arith.constant 0 : index
    %c0_69 = arith.constant 0 : index
    %73 = vector.load %arg11[%c0_68, %c0_69] : memref<1x128xf32, #tpu.memory_space<vmem>>, vector<1x128xf32>
    %74 = arith.addf %72, %73 : vector<1x128xf32>
    %c0_70 = arith.constant 0 : index
    %c0_71 = arith.constant 0 : index
    %c0_72 = arith.constant 0 : index
    %75 = vector.load %arg12[%c0_70, %c0_71, %c0_72] : memref<1x1x128xf32, #tpu.memory_space<vmem>>, vector<1x1x128xf32>
    %76 = vector.shape_cast %75 : vector<1x1x128xf32> to vector<1x128xf32>
    %77 = vector.shape_cast %74 : vector<1x128xf32> to vector<1x1x128xf32>
    tpu.vector_store %arg12[%c0_70, %c0_71, %c0_72], %77 {strides = array<i32>} : memref<1x1x128xf32, #tpu.memory_space<vmem>>, vector<1x1x128xf32>,
    return
  }
  func.func @transform_0(%arg0: i32) -> (i32, i32, i32) {
    %c0_i32 = arith.constant 0 : i32
    %c0_i32_0 = arith.constant 0 : i32
    %c0_i32_1 = arith.constant 0 : i32
    return %arg0, %c0_i32, %c0_i32_0 : i32, i32, i32
  }
  func.func @transform_1(%arg0: i32) -> (i32, i32, i32) {
    %c0_i32 = arith.constant 0 : i32
    %c0_i32_0 = arith.constant 0 : i32
    %c0_i32_1 = arith.constant 0 : i32
    %c0_i32_2 = arith.constant 0 : i32
    return %c0_i32, %c0_i32_0, %c0_i32_1 : i32, i32, i32
  }
  func.func @transform_2(%arg0: i32) -> (i32, i32) {
    %c0_i32 = arith.constant 0 : i32
    %c0_i32_0 = arith.constant 0 : i32
    %c0_i32_1 = arith.constant 0 : i32
    return %c0_i32, %c0_i32_0 : i32, i32
  }
  func.func @transform_3(%arg0: i32) -> (i32, i32) {
    %c0_i32 = arith.constant 0 : i32
    %c0_i32_0 = arith.constant 0 : i32
    %c0_i32_1 = arith.constant 0 : i32
    return %c0_i32, %c0_i32_0 : i32, i32
  }
  func.func @transform_4(%arg0: i32) -> (i32, i32) {
    %c0_i32 = arith.constant 0 : i32
    %c0_i32_0 = arith.constant 0 : i32
    %c0_i32_1 = arith.constant 0 : i32
    return %c0_i32, %c0_i32_0 : i32, i32
  }
  func.func @transform_5(%arg0: i32) -> (i32, i32, i32) {
    %c0_i32 = arith.constant 0 : i32
    %c0_i32_0 = arith.constant 0 : i32
    %c0_i32_1 = arith.constant 0 : i32
    %c0_i32_2 = arith.constant 0 : i32
    return %c0_i32, %c0_i32_0, %c0_i32_1 : i32, i32, i32
  }
  func.func @transform_6(%arg0: i32) -> (i32, i32) {
    %c0_i32 = arith.constant 0 : i32
    %c0_i32_0 = arith.constant 0 : i32
    %c0_i32_1 = arith.constant 0 : i32
    return %c0_i32, %c0_i32_0 : i32, i32
  }
  func.func @transform_7(%arg0: i32) -> (i32, i32) {
    %c0_i32 = arith.constant 0 : i32
    %c0_i32_0 = arith.constant 0 : i32
    %c0_i32_1 = arith.constant 0 : i32
    return %c0_i32, %c0_i32_0 : i32, i32
  }
  func.func @transform_8(%arg0: i32) -> (i32, i32) {
    %c0_i32 = arith.constant 0 : i32
    %c0_i32_0 = arith.constant 0 : i32
    %c0_i32_1 = arith.constant 0 : i32
    return %c0_i32, %c0_i32_0 : i32, i32
  }
  func.func @transform_9(%arg0: i32) -> (i32, i32) {
    %c0_i32 = arith.constant 0 : i32
    %c0_i32_0 = arith.constant 0 : i32
    %c0_i32_1 = arith.constant 0 : i32
    return %c0_i32, %c0_i32_0 : i32, i32
  }
  func.func @transform_10(%arg0: i32) -> (i32, i32) {
    %c0_i32 = arith.constant 0 : i32
    %c0_i32_0 = arith.constant 0 : i32
    %c0_i32_1 = arith.constant 0 : i32
    return %c0_i32, %c0_i32_0 : i32, i32
  }
  func.func @transform_11(%arg0: i32) -> (i32, i32, i32) {
    %c0_i32 = arith.constant 0 : i32
    %c0_i32_0 = arith.constant 0 : i32
    %c0_i32_1 = arith.constant 0 : i32
    return %arg0, %c0_i32, %c0_i32_0 : i32, i32, i32
  }
}

</mosaic_0001>

<bundles_post_ra>
// kernel: tpu_custom_call.1
= control target key start
LH: loop header
LB: loop body
LE: loop exit
PB: predicated region body
PF: predicated region fallthrough
CT: control target
= control target key end

     0   :  { %s2472_s0 = inlined_call_operand.hbm [shape: f32[2,16,48], index: 0, kind: input, shape index: {}]   ;;  %s2473_s1 = inlined_call_operand.hbm [shape: bf16[3,48,128], index: 1, kind: input, shape index: {}]   ;;  %s2474_s2 = inlined_call_operand.hbm [shape: f32[1,48], index: 2, kind: input, shape index: {}]   ;;  %s2475_s3 = inlined_call_operand.hbm [shape: f32[1,128], index: 3, kind: input, shape index: {}]   ;;  %s2476_s4 = inlined_call_operand.hbm [shape: f32[1,128], index: 4, kind: input, shape index: {}]   ;;  %s2477_s5 = inlined_call_operand.hbm [shape: bf16[3,128,256], index: 5, kind: input, shape index: {}]   ;;  %s2478_s6 = inlined_call_operand.vmem [shape: f32[1,128], index: 6, kind: input, shape index: {}]   ;;  %s2479_s7 = inlined_call_operand.vmem [shape: f32[1,256], index: 7, kind: input, shape index: {}]   ;;  %s2480_s8 = inlined_call_operand.vmem [shape: f32[1,256], index: 8, kind: input, shape index: {}]   ;;  %s2481_s9 = inlined_call_operand.hbm [shape: bf16[256,128], index: 9, kind: input, shape index: {}]   ;;  %s2482_s10 = inlined_call_operand.vmem [shape: f32[1,128], index: 10, kind: input, shape index: {}]   ;;  %s2483_s11 = inlined_call_operand.hbm [shape: f32[2,1,128], index: 11, kind: output, shape index: {}]  }
   0x1   :  { %2486 = sst [smem:[#allocation22_spill]] %s2473_s1 }
   0x2   :  { %2487 = sst [smem:[#allocation23_spill]] %s2474_s2 }
   0x3   :  { %2488 = sst [smem:[#allocation24_spill]] %s2475_s3 }
   0x4   :  { %2489 = sst [smem:[#allocation25_spill]] %s2476_s4 }
   0x5   :  { %2490 = sst [smem:[#allocation26_spill]] %s2477_s5 }
   0x6   :  { %2491 = sst [smem:[#allocation27_spill]] %s2481_s9 }
   0x7   :  { %16 = vsyncpa [#allocation5], 0 }
   0x8   :  { %18 = vsyncpa [#allocation5 + $0x1], 0 }
   0x9   :  { %19 = vsyncpa [#allocation8], 0 }
   0xa   :  { %20 = vsyncpa [#allocation11], 0 }
   0xb   :  { %21 = vsyncpa [#allocation14], 0 }
   0xc   :  { %22 = vsyncpa [#allocation6], 0 }
   0xd   :  { %24 = vsyncpa [#allocation6 + $0x1], 0  ;;  %s2261_s17 = smov 0   ;;  %s2263_s18 = smov 0  }
   0xe   :  { %s2265_s19 = smov 0   ;;  %s2267_s20 = smov 0  }
   0xf LB: > { %s2492_s1 = sld [smem:[#allocation22_spill]]  ;;  %s2285_s24 = sadd.s32 4294967295, %s2188_s20   ;;  %s2188_s20 = sphi %s2267_s20, %s2511_s20   ;;  %s2184_s19 = sphi %s2265_s19, %s2510_s19   ;;  %s2180_s18 = sphi %s2263_s18, %s2509_s18   ;;  %s2176_s17 = sphi %s2261_s17, %s2508_s17  }
  0x10   : > { %p1394_p0 = scmp.ge.s32.totalorder %s2188_s20, 1  ;;  %p51_p1 = scmp.eq.s32.totalorder %s2285_s24, 0 }
  0x11   : > { %p297_p2 = scmp.lt.s32.totalorder %s2188_s20, 3  ;;  %s2190_s26 = smov [#allocation7]  }
  0x12   : > { %s310_s27 = sshll.u32 %s2190_s26, 4  ;;  %s2494_s3 = sld [smem:[#allocation24_spill]]  ;;  %s311_s27 = int_to_ptr.vmem [resolvable:$true] %s310_s27 }
  0x13   : > { %p2290_p3 = pnand %p1394_p0, %p297_p2  ;;  %s2496_s5 = sld [smem:[#allocation26_spill]] }
  0x14   : > { %s2191_s16 = smov [#allocation10]   ;;  %s2192_s22 = smov 64  }
  0x15   : > { %s308_s23 = sshll.u32 %s2492_s1, 4  ;;  %p1812_p4 = pneg %p2290_p3  ;;  %s309_s23 = int_to_ptr.hbm [resolvable:$true] %s308_s23 }
  0x16   : > { %s337_s21 = sshll.u32 %s2191_s16, 4  ;;  %s2193_s26 = smov 4   ;;  %s338_s21 = int_to_ptr.vmem [resolvable:$true] %s337_s21 }
  0x17   : > { %p2302_p6 = pnand %p1812_p4, %p51_p1  ;;  %s2194_s28 = smov [#allocation13]  }
  0x18   : > { %s335_s30 = sshll.u32 %s2494_s3, 4  ;;  %s360_s29 = sshll.u32 %s2194_s28, 4  ;;  %s336_s30 = int_to_ptr.hbm [resolvable:$true] %s335_s30  ;;  %s361_s29 = int_to_ptr.vmem [resolvable:$true] %s360_s29 }
  0x19   : > { %s358_s15 = sshll.u32 %s2496_s5, 4  ;;  %s2497_s2 = sld [smem:[#allocation23_spill]]  ;;  %s359_s15 = int_to_ptr.hbm [resolvable:$true] %s358_s15 }
  0x1a   : > { %1815 = dma.hbm_to_vmem [thread:$0]  (!%p2302_p6), %s309_s23, 1152, %s311_s27, [#allocation8], %s2192_s22, %s2192_s22, %s2193_s26  }
  0x1b   : > { %1821 = dma.hbm_to_vmem [thread:$0]  (!%p2302_p6), %s336_s30, 16, %s338_s21, [#allocation11]  }
  0x1c   : > { %s2484_s16 = smov 128   ;;  %s2485_s3 = smov 8  }
  0x1d   : > { %1827 = dma.hbm_to_vmem [thread:$0]  (!%p2302_p6), %s359_s15, 6144, %s361_s29, [#allocation14], %s2484_s16, %s2484_s16, %s2485_s3  }
  0x1e   : > { %s2197_s23 = smov [#allocation9]   ;;  %s2498_s4 = sld [smem:[#allocation25_spill]] }
  0x1f   : > { %s323_s1 = sshll.u32 %s2497_s2, 4  ;;  %s325_s27 = sshll.u32 %s2197_s23, 4  ;;  %s324_s1 = int_to_ptr.hbm [resolvable:$true] %s323_s1  ;;  %s326_s27 = int_to_ptr.vmem [resolvable:$true] %s325_s27 }
  0x20   : > { %1818 = dma.hbm_to_vmem [thread:$0]  (!%p2302_p6), %s324_s1, 16, %s326_s27, [#allocation8]  }
  0x21   : > { %s2499_s9 = sld [smem:[#allocation27_spill]]  ;;  %s2198_s29 = smov [#allocation12]  }
  0x22   : > { %s349_s23 = sshll.u32 %s2198_s29, 4  ;;  %s2199_s30 = smov [#allocation15]   ;;  %s350_s23 = int_to_ptr.vmem [resolvable:$true] %s349_s23 }
  0x23   : > { %s383_s1 = sshll.u32 %s2199_s30, 4  ;;  %s1393_s27 = sadd.s32 4294967294, %s2188_s20   ;;  %s384_s1 = int_to_ptr.vmem [resolvable:$true] %s383_s1 }
  0x24   : > { %s347_s28 = sshll.u32 %s2498_s4, 4  ;;  %s2341_s21 = sadd.s32 1, %s2188_s20   ;;  %s348_s28 = int_to_ptr.hbm [resolvable:$true] %s347_s28 }
  0x25   : > { %1824 = dma.hbm_to_vmem [thread:$0]  (!%p2302_p6), %s348_s28, 16, %s350_s23, [#allocation11]  }
  0x26   : > { %s34_s13 = ssub.s32 %s2188_s20, %s2341_s21  ;;  %s37_s14 = sadd.s32 1, %s2184_s19 }
  0x27   : > { %s381_s15 = sshll.u32 %s2499_s9, 4  ;;  %p35_p7 = scmp.eq.s32.totalorder %s34_s13, 0  ;;  %s382_s15 = int_to_ptr.hbm [resolvable:$true] %s381_s15 }
  0x28   : > { %1830 = dma.hbm_to_vmem [thread:$0]  (!%p2302_p6), %s382_s15, 2048, %s384_s1, [#allocation14], %s2192_s22, %s2192_s22, %s2193_s26  }
  0x29   : > { %p44_p8 = scmp.ne.s32.totalorder %s2184_s19, %s2180_s18  ;;  %p45_p9 = scmp.eq.s32.totalorder %s2188_s20, 0 }
  0x2a   : > { %p50_p10 = scmp.ne.s32.totalorder %s2180_s18, %s2176_s17  ;;  %p284_p13 = scmp.eq.s32.totalorder %s2285_s24, 1 }
  0x2b   : > { %s2352_s28 = scalar_select %p35_p7, %s2184_s19, %s37_s14  }
  0x2c   : > { %p2354_p11 = por %p45_p9, %p44_p8  ;;  %p2360_p12 = por %p51_p1, %p50_p10 }
  0x2d   : > { %p290_p0 = scmp.eq.s32.totalorder %s1393_s27, 1  ;;  %p1845_p2 = scmp.lt.s32.totalorder %s2188_s20, 2 }
  0x2e   : > { %s400_s26 = sand.u32 1, %s2184_s19   ;;  %p2367_p4 = por %p284_p13, %p44_p8 }
  0x2f   : > { %p2371_p6 = por %p290_p0, %p50_p10  ;;  %s1402_s23 = sshll.u32 %s400_s26, 4 }
  0x30   : > { %s1710_s30 = sshll.u32 %s2188_s20, 4  ;;  %s404_s16 = scalar_lea.vmem [#allocation4], %s1402_s23 }
  0x31   : > { %s409_s14 = scalar_lea.hbm %s2472_s0, %s1710_s30  ;;  %s412_s3 = sshll.u32 %s404_s16, 4  ;;  %s413_s3 = int_to_ptr.vmem [resolvable:$true] %s412_s3 }
  0x32   : > { %s410_s2 = sshll.u32 %s409_s14, 4  ;;  %p2381_p7 = pnand %p1845_p2, %p2354_p11  ;;  %s411_s2 = int_to_ptr.hbm [resolvable:$true] %s410_s2 }
  0x33   : > { %s401_s4 = scalar_lea.sflag [#allocation5], %s400_s26  ;;  %s2080_s5 = sshra.s32 %s411_s2, 4  ;;  %s2081_s5 = int_to_ptr.hbm [resolvable:$true] %s2080_s5 }
  0x34   : > { %s2082_s9 = scalar_lea.hbm %s2081_s5, 16  ;;  %p2084_p9 = pneg %p2381_p7 }
  0x35   : > { %p2083_p8 = scmp.ne.s32.totalorder %s2081_s5, %s2082_s9  ;;  %s2087_s30 = scalar_lea.hbm %s2472_s0, 32 }
  0x36   : > { %p2088_p11 = scmp.lt.s32.totalorder %s2081_s5, %s2472_s0  ;;  %p2089_p0 = scmp.lt.s32.totalorder %s2087_s30, %s2082_s9 }
  0x37   : > { %p2085_p10 = pnand %p2084_p9, %p2083_p8 }
  0x38   : > { %p2090_p2 = por %p2089_p0, %p2088_p11 }
  0x39   : > { %p2086_p13 = pneg %p2085_p10 }
  0x3b   : > { %p2091_p5 = pnand %p2090_p2, %p2086_p13 }
  0x3d   : > { %2094 = shalt.err (!%p2091_p5)
}
  0x3e   : > { %s2505_s26 = smov 8   ;;  %s2506_s13 = smov 128  }
  0x3f   : > { %1834 = dma.hbm_to_vmem [thread:$0]  (!%p2381_p7), %s411_s2, 256, %s413_s3, %s401_s4, %s2506_s13, %s2506_s13, %s2505_s26  }
  0x40   : > { %424 = sbr.rel (%p2290_p3) target bundleno = 562 (0x232), region = 64  ;;  %s2401_s14 = sand.u32 (!%p2290_p3), 1, %s2180_s18  }
  0x41   : > { %s1406_s5 = sshll.u32 (!%p2290_p3), %s2401_s14, 4  ;;  %s427_s9 = scalar_lea.sflag (!%p2290_p3), [#allocation5], %s2401_s14 }
  0x42   : > { %s430_s23 = scalar_lea.vmem (!%p2290_p3), [#allocation4], %s1406_s5 }
  0x45   : > { %2155 = dma.done.wait (%p2360_p12), %s427_s9, 256  }
  0x46   : > { %2157 = vsyncadd (%p2360_p12), %s427_s9, 4294967040 }
  0x47   : > { %2159 = dma.done.wait (%p51_p1), [#allocation8], 1168  }
  0x48   : > { %2161 = vsyncadd (%p51_p1), [#allocation8], 4294966128 }
  0x49   : > { %2163 = dma.done.wait (%p51_p1), [#allocation11], 32  }
  0x4a   : > { %2165 = vsyncadd (%p51_p1), [#allocation11], 4294967264 }
  0x4b   : > { %2167 = dma.done.wait (%p51_p1), [#allocation14], 8192  }
  0x4c   : > { %2169 = vsyncadd (%p51_p1), [#allocation14], 4294959104  ;;  %vm502_vm0 = vcmask 385024   ;;  %v2200_v0 = vmov 0.0   ;;  %v1716_v1 = vld [vmem:[#allocation7 + $0x28] sm:$0xff]  ;;  %v1713_v2 = vld [vmem:[#allocation7 + $0x10] sm:$0xff]  ;;  %s1266_s1 = scalar_lea.hbm %s2483_s11, %s2285_s24 }
  0x4d   : > { %503 = vst.msk [vmem:[#allocation2] sm:$0x1] %vm502_vm0, %v2200_v0  ;;  %v1719_v3 = vld [vmem:[#allocation7 + $0x40] sm:$0xff]  ;;  %559 = vmatpush.bf16.msra.mxu0 %v1716_v1  ;;  %594 = vmatpush.bf16.msra.mxu1 %v1713_v2  ;;  %v1712_v5 = vld [vmem:[#allocation7 + $0x8] sm:$0xff]  ;;  %v1718_v6 = vld [vmem:[#allocation7 + $0x38] sm:$0xff]  ;;  %vm511_vm1 = vcmask 392192  }
  0x4e   : > { %504 = vst.msk [vmem:[#allocation2 + $0x11] sm:$0x1] %vm502_vm0, %v2200_v0  ;;  %v1715_v4 = vld [vmem:[#allocation7 + $0x20] sm:$0xff]  ;;  %639 = vmatpush.bf16.msra.mxu2 %v1719_v3  ;;  %v501_v8 = vld [vmem:[%s430_s23 + $0x8] sm:$0xff]  ;;  %v1717_v18 = vld [vmem:[#allocation7 + $0x30] sm:$0xff]  ;;  %s498_s13 = scalar_lea.vmem [#allocation16], %s2401_s14 }
  0x4f   : > { %664 = vst [vmem:[#allocation3] sm:$0x1] %v2200_v0  ;;  %v500_v7 = vld [vmem:[%s430_s23] sm:$0xff]  ;;  %v1714_v9 = vld [vmem:[#allocation7 + $0x18] sm:$0xff]  ;;  %v1896_v10 = vld [vmem:[#allocation9] ss:$0 sm:$0xff] }
  0x50   : > { %665 = vst [vmem:[#allocation3 + $0x11] sm:$0x1] %v2200_v0  ;;  %v1510_v11 = vld [vmem:[#allocation13 + $0xf0] sm:$0xf]  ;;  %v1751_v12 = vld [vmem:[#allocation13 + $0xf4] sm:$0xf0]  ;;  %v509_v19 = vmul.f32 %v1896_v10, %v500_v7  ;;  %v510_v20 = vmul.f32 %v1896_v10, %v501_v8 }
  0x51   : > { %v1511_v13 = vor.u32 %v1751_v12, %v1510_v11  ;;  %v1750_v14 = vld [vmem:[#allocation13 + $0xf4] sm:$0xf]  ;;  %v1512_v15 = vld [vmem:[#allocation13 + $0xf8] sm:$0xf0]  ;;  %v1502_v16 = vld [vmem:[#allocation13 + $0xe0] sm:$0xf]  ;;  %560 = vmatpush.bf16.msra.mxu0 %v1715_v4  ;;  %595 = vmatpush.bf16.msra.mxu1 %v1712_v5 }
  0x52   : > { %v1711_v17 = vld [vmem:[#allocation7] sm:$0xff]  ;;  %v1749_v21 = vld [vmem:[#allocation13 + $0xe4] sm:$0xf0]  ;;  %640 = vmatpush.bf16.msra.mxu2 %v1718_v6  ;;  %v1515_v22 = vor.u32 %v1750_v14, %v1512_v15  ;;  %v1748_v23 = vld [vmem:[#allocation13 + $0xe4] sm:$0xf]  ;;  %512 = vst.msk [vmem:[#allocation2 + $0x1] sm:$0xff] %vm511_vm1, %v509_v19 }
  0x53   : > { %793 = vmatpush.bf16.msra.mxu3 %v1511_v13  ;;  %v1504_v24 = vld [vmem:[#allocation13 + $0xe8] sm:$0xf0]  ;;  %v1494_v25 = vld [vmem:[#allocation13 + $0xd0] sm:$0xf]  ;;  %v1503_v26 = vor.u32 %v1749_v21, %v1502_v16  ;;  %v1747_v27 = vld [vmem:[#allocation13 + $0xd4] sm:$0xf0] }
  0x54   : > { %513 = vst.msk [vmem:[#allocation2 + $0x9] sm:$0xff] %vm511_vm1, %v510_v20  ;;  %v1507_v28 = vor.u32 %v1748_v23, %v1504_v24  ;;  %v1495_v29 = vor.u32 %v1747_v27, %v1494_v25  ;;  %v1746_v30 = vld [vmem:[#allocation13 + $0xd4] sm:$0xf]  ;;  %v1496_v31 = vld [vmem:[#allocation13 + $0xd8] sm:$0xf0]  ;;  %s1268_s5 = sshll.u32 %s498_s13, 4  ;;  %s1269_s5 = int_to_ptr.vmem [resolvable:$true] %s1268_s5 }
  0x55   : > { %561 = vmatpush.bf16.msra.mxu0 %v1714_v9  ;;  %596 = vmatpush.bf16.msra.mxu1 %v1711_v17  ;;  %v1499_v37 = vor.u32 %v1746_v30, %v1496_v31  ;;  %v1486_v42 = vld [vmem:[#allocation13 + $0xc0] sm:$0xf]  ;;  %v1745_v43 = vld [vmem:[#allocation13 + $0xc4] sm:$0xf0]  ;;  %v1744_v44 = vld [vmem:[#allocation13 + $0xc4] sm:$0xf] }
  0x56   : > { %641 = vmatpush.bf16.msra.mxu2 %v1717_v18  ;;  %v1487_v45 = vor.u32 %v1745_v43, %v1486_v42  ;;  %v1488_v46 = vld [vmem:[#allocation13 + $0xc8] sm:$0xf0]  ;;  %v1478_v48 = vld [vmem:[#allocation13 + $0xb0] sm:$0xf]  ;;  %v1743_v49 = vld [vmem:[#allocation13 + $0xb4] sm:$0xf0] }
  0x57   : > { %794 = vmatpush.bf16.msra.mxu3 %v1503_v26  ;;  %v1491_v47 = vor.u32 %v1744_v44, %v1488_v46  ;;  %v1742_v50 = vld [vmem:[#allocation13 + $0xb4] sm:$0xf]  ;;  %v1479_v51 = vor.u32 %v1743_v49, %v1478_v48  ;;  %v1480_v52 = vld [vmem:[#allocation13 + $0xb8] sm:$0xf0]  ;;  %v1574_v54 = vld [vmem:[#allocation13 + $0x70] sm:$0xf] }
  0x58   : > { %v1483_v53 = vor.u32 %v1742_v50, %v1480_v52  ;;  %v1735_v55 = vld [vmem:[#allocation13 + $0x74] sm:$0xf0]  ;;  %v1734_v56 = vld [vmem:[#allocation13 + $0x74] sm:$0xf]  ;;  %v1576_v58 = vld [vmem:[#allocation13 + $0x78] sm:$0xf0] }
  0x59   : > { %807 = vmatpush.bf16.msrb.mxu0 %v1515_v22  ;;  %v523_v32 = vld [vmem:[#allocation2 + $0x1] sm:$0xff]  ;;  %v1575_v57 = vor.u32 %v1735_v55, %v1574_v54  ;;  %v1579_v61 = vor.u32 %v1734_v56, %v1576_v58  ;;  %v1472_v0 = vld [vmem:[#allocation13 + $0xa8] sm:$0xf0]  ;;  %v1462_v2 = vld [vmem:[#allocation13 + $0x90] sm:$0xf]  ;;  %s1270_s9 = sshll.u32 %s1266_s1, 4  ;;  %s1271_s9 = int_to_ptr.hbm [resolvable:$true] %s1270_s9 }
  0x5a   : > { %v514_v33 = vld [vmem:[#allocation2] sm:$0xff]  ;;  %v1739_v3 = vld [vmem:[#allocation13 + $0x94] sm:$0xf0]  ;;  %v1738_v4 = vld [vmem:[#allocation13 + $0x94] sm:$0xf]  ;;  %s1258_s23 = scalar_lea.sflag [#allocation6], %s2401_s14 }
  0x5b   : > { %v524_v34 = vld [vmem:[#allocation2 + $0x9] sm:$0xff]  ;;  %795 = vmatpush.bf16.msra.mxu3 %v1495_v29  ;;  %v1470_v59 = vld [vmem:[#allocation13 + $0xa0] sm:$0xf]  ;;  %v1740_v63 = vld [vmem:[#allocation13 + $0xa4] sm:$0xf]  ;;  %901 = vmatpush.bf16.msrb.mxu1 %v1575_v57  ;;  %v1463_v8 = vor.u32 %v1739_v3, %v1462_v2  ;;  %s2124_s2 = sshra.s32 %s1271_s9, 4  ;;  %s2125_s2 = int_to_ptr.hbm [resolvable:$true] %s2124_s2 }
  0x5c   : > { %v515_v35 = vld [vmem:[#allocation2 + $0x8] sm:$0xff]  ;;  %v525_v38 = vpack.c.bf16 %v524_v34, %v523_v32  ;;  %v1475_v1 = vor.u32 %v1740_v63, %v1472_v0  ;;  %915 = vmatpush.bf16.msrb.mxu2 %v1579_v61  ;;  %v1566_v5 = vld [vmem:[#allocation13 + $0x60] sm:$0xf]  ;;  %v1732_v7 = vld [vmem:[#allocation13 + $0x64] sm:$0xf]  ;;  %s2126_s3 = scalar_lea.hbm %s2125_s2, 1  ;;  %p2131_p12 = scmp.lt.s32.totalorder %s2125_s2, %s2483_s11 }
  0x5d   : > { %808 = vmatpush.bf16.msrb.mxu0 %v1507_v28  ;;  %v603_v36 = vld [vmem:[#allocation2 + $0x2] sm:$0xff]  ;;  %v516_v39 = vpack.c.bf16 %v515_v35, %v514_v33  ;;  %v604_v40 = vld [vmem:[#allocation2 + $0xa] sm:$0xff]  ;;  %v1464_v11 = vld [vmem:[#allocation13 + $0x98] sm:$0xf0]  ;;  %p2127_p1 = scmp.ne.s32.totalorder %s2125_s2, %s2126_s3  ;;  %s2130_s25 = scalar_lea.hbm %s2483_s11, 2 }
  0x5e   : > { %v605_v41 = vpack.c.bf16 %v604_v40, %v603_v36  ;;  %1425 = vmatmul.msk.bf16.vlgmr.msra.gmra.mxu0 %vm511_vm1, %v525_v38  ;;  %v1741_v60 = vld [vmem:[#allocation13 + $0xa4] sm:$0xf0]  ;;  %v1568_v10 = vld [vmem:[#allocation13 + $0x68] sm:$0xf0]  ;;  %v1467_v13 = vor.u32 %v1738_v4, %v1464_v11  ;;  %v1454_v14 = vld [vmem:[#allocation13 + $0x80] sm:$0xf]  ;;  %p2132_p7 = scmp.lt.s32.totalorder %s2130_s25, %s2126_s3 }
  0x5f   : > { %1438 = vmatmul.msk.bf16.vlgmr.msra.gmra.mxu1 %vm511_vm1, %v516_v39  ;;  %796 = vmatpush.bf16.msra.mxu3 %v1487_v45  ;;  %v1471_v62 = vor.u32 %v1741_v60, %v1470_v59  ;;  %v1733_v6 = vld [vmem:[#allocation13 + $0x64] sm:$0xf0]  ;;  %v1571_v12 = vor.u32 %v1732_v7, %v1568_v10  ;;  %v1736_v16 = vld [vmem:[#allocation13 + $0x84] sm:$0xf]  ;;  %v1558_v17 = vld [vmem:[#allocation13 + $0x50] sm:$0xf]  ;;  %p2128_p3 = pnand %p2127_p1, %p2367_p4 }
  0x60   : > { %1451 = vmatmul.msk.bf16.vlgmr.msra.gmra.mxu2 %vm511_vm1, %v605_v41  ;;  %v1567_v9 = vor.u32 %v1733_v6, %v1566_v5  ;;  %v1737_v15 = vld [vmem:[#allocation13 + $0x84] sm:$0xf0]  ;;  %v1731_v18 = vld [vmem:[#allocation13 + $0x54] sm:$0xf0]  ;;  %v1730_v21 = vld [vmem:[#allocation13 + $0x54] sm:$0xf]  ;;  %p2133_p8 = por %p2132_p7, %p2131_p12 }
  0x61   : > { %809 = vmatpush.bf16.msrb.mxu0 %v1499_v37  ;;  %916 = vmatpush.bf16.msrb.mxu2 %v1571_v12  ;;  %v1455_v19 = vor.u32 %v1737_v15, %v1454_v14  ;;  %v1559_v20 = vor.u32 %v1731_v18, %v1558_v17  ;;  %v1560_v22 = vld [vmem:[#allocation13 + $0x58] sm:$0xf0]  ;;  %v1456_v23 = vld [vmem:[#allocation13 + $0x88] sm:$0xf0]  ;;  %v1638_v26 = vld [vmem:[#allocation13 + $0x170] sm:$0xf]  ;;  %p2129_p5 = pneg %p2128_p3 }
  0x62   : > { %902 = vmatpush.bf16.msrb.mxu1 %v1567_v9  ;;  %v1563_v24 = vor.u32 %v1730_v21, %v1560_v22  ;;  %v1459_v25 = vor.u32 %v1736_v16, %v1456_v23  ;;  %v1767_v27 = vld [vmem:[#allocation13 + $0x174] sm:$0xf0]  ;;  %v1766_v28 = vld [vmem:[#allocation13 + $0x174] sm:$0xf]  ;;  %v1640_v30 = vld [vmem:[#allocation13 + $0x178] sm:$0xf0] }
  0x63   : > { %797 = vmatpush.bf16.msra.mxu3 %v1479_v51  ;;  %v1639_v29 = vor.u32 %v1767_v27, %v1638_v26  ;;  %v1550_v31 = vld [vmem:[#allocation13 + $0x40] sm:$0xf]  ;;  %v1729_v32 = vld [vmem:[#allocation13 + $0x44] sm:$0xf0]  ;;  %v1643_v33 = vor.u32 %v1766_v28, %v1640_v30  ;;  %v1728_v35 = vld [vmem:[#allocation13 + $0x44] sm:$0xf]  ;;  %p2134_p9 = pnand %p2133_p8, %p2129_p5 }
  0x64   : > { %v1551_v34 = vor.u32 %v1729_v32, %v1550_v31  ;;  %v1552_v36 = vld [vmem:[#allocation13 + $0x48] sm:$0xf0]  ;;  %v1630_v37 = vld [vmem:[#allocation13 + $0x160] sm:$0xf]  ;;  %v1765_v39 = vld [vmem:[#allocation13 + $0x164] sm:$0xf0] }
  0x65   : > { %810 = vmatpush.bf16.msrb.mxu0 %v1491_v47  ;;  %917 = vmatpush.bf16.msrb.mxu2 %v1563_v24  ;;  %v1555_v38 = vor.u32 %v1728_v35, %v1552_v36  ;;  %v1764_v40 = vld [vmem:[#allocation13 + $0x164] sm:$0xf]  ;;  %v1632_v41 = vld [vmem:[#allocation13 + $0x168] sm:$0xf0]  ;;  %v1631_v42 = vor.u32 %v1765_v39, %v1630_v37  ;;  %v1542_v44 = vld [vmem:[#allocation13 + $0x30] sm:$0xf] }
  0x66   : > { %903 = vmatpush.bf16.msrb.mxu1 %v1559_v20  ;;  %v1635_v43 = vor.u32 %v1764_v40, %v1632_v41  ;;  %v1727_v45 = vld [vmem:[#allocation13 + $0x34] sm:$0xf0]  ;;  %v1726_v46 = vld [vmem:[#allocation13 + $0x34] sm:$0xf]  ;;  %v1544_v48 = vld [vmem:[#allocation13 + $0x38] sm:$0xf0] }
  0x67   : > { %798 = vmatpush.bf16.msra.mxu3 %v1471_v62  ;;  %v1543_v47 = vor.u32 %v1727_v45, %v1542_v44  ;;  %v1622_v49 = vld [vmem:[#allocation13 + $0x150] sm:$0xf]  ;;  %v1763_v50 = vld [vmem:[#allocation13 + $0x154] sm:$0xf0]  ;;  %v1547_v51 = vor.u32 %v1726_v46, %v1544_v48  ;;  %v1624_v54 = vld [vmem:[#allocation13 + $0x158] sm:$0xf0] }
  0x68   : > { %v1623_v52 = vor.u32 %v1763_v50, %v1622_v49  ;;  %v1534_v56 = vld [vmem:[#allocation13 + $0x20] sm:$0xf]  ;;  %v1725_v57 = vld [vmem:[#allocation13 + $0x24] sm:$0xf0]  ;;  %v1724_v58 = vld [vmem:[#allocation13 + $0x24] sm:$0xf] }
  0x69   : > { %811 = vmatpush.bf16.msrb.mxu0 %v1483_v53  ;;  %918 = vmatpush.bf16.msrb.mxu2 %v1555_v38  ;;  %v1762_v53 = vld [vmem:[#allocation13 + $0x154] sm:$0xf]  ;;  %v1535_v59 = vor.u32 %v1725_v57, %v1534_v56  ;;  %v1536_v60 = vld [vmem:[#allocation13 + $0x28] sm:$0xf0]  ;;  %v1614_v61 = vld [vmem:[#allocation13 + $0x140] sm:$0xf] }
  0x6a   : > { %904 = vmatpush.bf16.msrb.mxu1 %v1551_v34  ;;  %v1627_v55 = vor.u32 %v1762_v53, %v1624_v54  ;;  %v1761_v62 = vld [vmem:[#allocation13 + $0x144] sm:$0xf0]  ;;  %v1539_v63 = vor.u32 %v1724_v58, %v1536_v60  ;;  %v1616_v2 = vld [vmem:[#allocation13 + $0x148] sm:$0xf0]  ;;  %v1526_v4 = vld [vmem:[#allocation13 + $0x10] sm:$0xf] }
  0x6b   : > { %799 = vmatpush.bf16.msra.mxu3 %v1463_v8  ;;  %v1615_v0 = vor.u32 %v1761_v62, %v1614_v61  ;;  %v1723_v5 = vld [vmem:[#allocation13 + $0x14] sm:$0xf0]  ;;  %v1722_v6 = vld [vmem:[#allocation13 + $0x14] sm:$0xf]  ;;  %v1528_v8 = vld [vmem:[#allocation13 + $0x18] sm:$0xf0] }
  0x6c   : > { %v1527_v7 = vor.u32 %v1723_v5, %v1526_v4  ;;  %v1518_v9 = vld [vmem:[#allocation13] sm:$0xf]  ;;  %v1721_v10 = vld [vmem:[#allocation13 + $0x4] sm:$0xf0]  ;;  %v1531_v11 = vor.u32 %v1722_v6, %v1528_v8  ;;  %v1720_v12 = vld [vmem:[#allocation13 + $0x4] sm:$0xf] }
  0x6d   : > { %812 = vmatpush.bf16.msrb.mxu0 %v1475_v1  ;;  %919 = vmatpush.bf16.msrb.mxu2 %v1547_v51  ;;  %v1760_v1 = vld [vmem:[#allocation13 + $0x144] sm:$0xf]  ;;  %v1606_v14 = vld [vmem:[#allocation13 + $0x130] sm:$0xf]  ;;  %v1519_v15 = vor.u32 %v1721_v10, %v1518_v9  ;;  %v1759_v16 = vld [vmem:[#allocation13 + $0x134] sm:$0xf0] }
  0x6e   : > { %905 = vmatpush.bf16.msrb.mxu1 %v1543_v47  ;;  %v1619_v3 = vor.u32 %v1760_v1, %v1616_v2  ;;  %v1758_v17 = vld [vmem:[#allocation13 + $0x134] sm:$0xf]  ;;  %v1608_v18 = vld [vmem:[#allocation13 + $0x138] sm:$0xf0]  ;;  %v1607_v20 = vor.u32 %v1759_v16, %v1606_v14  ;;  %v1598_v22 = vld [vmem:[#allocation13 + $0x120] sm:$0xf] }
  0x6f   : > { %800 = vmatpush.bf16.msra.mxu3 %v1455_v19  ;;  %v1611_v21 = vor.u32 %v1758_v17, %v1608_v18  ;;  %v1757_v23 = vld [vmem:[#allocation13 + $0x124] sm:$0xf0]  ;;  %v1756_v24 = vld [vmem:[#allocation13 + $0x124] sm:$0xf]  ;;  %v1590_v30 = vld [vmem:[#allocation13 + $0x110] sm:$0xf] }
  0x70   : > { %v1599_v26 = vor.u32 %v1757_v23, %v1598_v22  ;;  %v1755_v31 = vld [vmem:[#allocation13 + $0x114] sm:$0xf0]  ;;  %v1754_v32 = vld [vmem:[#allocation13 + $0x114] sm:$0xf]  ;;  %v1582_v37 = vld [vmem:[#allocation13 + $0x100] sm:$0xf] }
  0x71   : > { %813 = vmatpush.bf16.msrb.mxu0 %v1467_v13  ;;  %920 = vmatpush.bf16.msrb.mxu2 %v1539_v63  ;;  %v1520_v13 = vld [vmem:[#allocation13 + $0x8] sm:$0xf0]  ;;  %v1591_v35 = vor.u32 %v1755_v31, %v1590_v30  ;;  %v1753_v38 = vld [vmem:[#allocation13 + $0x104] sm:$0xf0]  ;;  %v1752_v39 = vld [vmem:[#allocation13 + $0x104] sm:$0xf] }
  0x72   : > { %906 = vmatpush.bf16.msrb.mxu1 %v1535_v59  ;;  %v1523_v19 = vor.u32 %v1720_v12, %v1520_v13  ;;  %v1584_v40 = vld [vmem:[#allocation13 + $0x108] sm:$0xf0]  ;;  %v1897_v41 = vld [vmem:[#allocation10] ss:$0 sm:$0xff]  ;;  %v1898_v44 = vld [vmem:[#allocation12] ss:$0 sm:$0xff]  ;;  %v1583_v45 = vor.u32 %v1753_v38, %v1582_v37 }
  0x73   : > { %1029 = vmatpush.bf16.msrb.mxu3 %v1639_v29  ;;  %v1587_v46 = vor.u32 %v1752_v39, %v1584_v40  ;;  %v1899_v51 = vld [vmem:[%s2478_s6] ss:$0 sm:$0xff]  ;;  %v1783_v4 = vld [vmem:[#allocation15 + $0x78] sm:$0xff]  ;;  %v1782_v5 = vld [vmem:[#allocation15 + $0x70] sm:$0xff] }
  0x74   : > { %v1775_v6 = vld [vmem:[#allocation15 + $0x38] sm:$0xff]  ;;  %v1774_v8 = vld [vmem:[#allocation15 + $0x30] sm:$0xff]  ;;  %v1780_v9 = vld [vmem:[#allocation15 + $0x60] sm:$0xff] }
  0x75   : > { %814 = vmatpush.bf16.msrb.mxu0 %v1459_v25  ;;  %921 = vmatpush.bf16.msrb.mxu2 %v1531_v11  ;;  %v1600_v25 = vld [vmem:[#allocation13 + $0x128] sm:$0xf0]  ;;  %v1779_v12 = vld [vmem:[#allocation15 + $0x58] sm:$0xff]  ;;  %v1772_v13 = vld [vmem:[#allocation15 + $0x20] sm:$0xff] }
  0x76   : > { %907 = vmatpush.bf16.msrb.mxu1 %v1527_v7  ;;  %v1603_v27 = vor.u32 %v1756_v24, %v1600_v25  ;;  %v1781_v7 = vld [vmem:[#allocation15 + $0x68] sm:$0xff]  ;;  %v1778_v14 = vld [vmem:[#allocation15 + $0x50] sm:$0xff]  ;;  %v1771_v16 = vld [vmem:[#allocation15 + $0x18] sm:$0xff] }
  0x77   : > { %1030 = vmatpush.bf16.msrb.mxu3 %v1631_v42  ;;  %v1773_v10 = vld [vmem:[#allocation15 + $0x28] sm:$0xff]  ;;  %v1071_v31 = vld [vmem:[%s2480_s8] sm:$0x3] }
  0x78   : > { %v1777_v18 = vld [vmem:[#allocation15 + $0x48] sm:$0xff]  ;;  %v1074_v37 = vperm.slane %v1071_v31, 1 }
  0x79   : > { %1043 = vmatpush.bf16.msra.mxu0 %v1643_v33  ;;  %922 = vmatpush.bf16.msrb.mxu2 %v1523_v19  ;;  %v1592_v33 = vld [vmem:[#allocation13 + $0x118] sm:$0xf0]  ;;  %v1770_v19 = vld [vmem:[#allocation15 + $0x10] sm:$0xff] }
  0x7a   : > { %908 = vmatpush.bf16.msrb.mxu1 %v1519_v15  ;;  %v1595_v36 = vor.u32 %v1754_v32, %v1592_v33 }
  0x7b   : > { %1031 = vmatpush.bf16.msrb.mxu3 %v1623_v52 }
  0x7d   : > { %1044 = vmatpush.bf16.msra.mxu0 %v1635_v43  ;;  %1243 = vmatpush.bf16.msra.mxu2 %v1783_v4 }
  0x7e   : > { %1230 = vmatpush.bf16.msra.mxu1 %v1775_v6 }
  0x7f   : > { %1032 = vmatpush.bf16.msrb.mxu3 %v1615_v0 }
  0x81   : > { %1045 = vmatpush.bf16.msra.mxu0 %v1627_v55  ;;  %1244 = vmatpush.bf16.msra.mxu2 %v1782_v5 }
  0x82   : > { %1231 = vmatpush.bf16.msra.mxu1 %v1774_v8 }
  0x83   : > { %1033 = vmatpush.bf16.msrb.mxu3 %v1607_v20  ;;  %v1776_v20 = vld [vmem:[#allocation15 + $0x40] sm:$0xff] }
  0x85   : > { %1046 = vmatpush.bf16.msra.mxu0 %v1619_v3  ;;  %1245 = vmatpush.bf16.msra.mxu2 %v1781_v7 }
  0x86   : > { %1232 = vmatpush.bf16.msra.mxu1 %v1773_v10  ;;  %v1133_v10 = vld [vmem:[%s2482_s10] sm:$0x1] }
  0x87   : > { %1034 = vmatpush.bf16.msrb.mxu3 %v1599_v26 }
  0x89   : > { %1047 = vmatpush.bf16.msra.mxu0 %v1611_v21  ;;  %1246 = vmatpush.bf16.msra.mxu2 %v1780_v9  ;;  %v1769_v21 = vld [vmem:[#allocation15 + $0x8] sm:$0xff] }
  0x8a   : > { %1233 = vmatpush.bf16.msra.mxu1 %v1772_v13 }
  0x8b   : > { %1035 = vmatpush.bf16.msrb.mxu3 %v1591_v35 }
  0x8d   : > { %1048 = vmatpush.bf16.msra.mxu0 %v1603_v27  ;;  %1247 = vmatpush.bf16.msra.mxu2 %v1779_v12  ;;  %v1061_v27 = vld [vmem:[%s2479_s7] sm:$0x3] }
  0x8e   : > { %1234 = vmatpush.bf16.msra.mxu1 %v1771_v16  ;;  %v1064_v30 = vperm.slane %v1061_v27, 1  ;;  %v1063_v40 = vperm.slane %v1061_v27, 0 }
  0x8f   : > { %1036 = vmatpush.bf16.msrb.mxu3 %v1583_v45 }
  0x91   : > { %1049 = vmatpush.bf16.msra.mxu0 %v1595_v36  ;;  %1248 = vmatpush.bf16.msra.mxu2 %v1778_v14 }
  0x92   : > { %1235 = vmatpush.bf16.msra.mxu1 %v1770_v19 }
  0x95   : > { %1050 = vmatpush.bf16.msra.mxu0 %v1587_v46  ;;  %1249 = vmatpush.bf16.msra.mxu2 %v1777_v18 }
  0x96   : > { %1236 = vmatpush.bf16.msra.mxu1 %v1769_v21 }
  0x99   : > { %1250 = vmatpush.bf16.msra.mxu2 %v1776_v20 }
  0xdb   : > { %v563_v28 = vpop.f32.mrf.mxu0 }
  0xdc   : > { %v598_v29 = vpop.f32.mrf.mxu1 }
  0xdd   : > { %v599_v34 = vadd.f32 %v598_v29, %v563_v28  ;;  %v1768_v28 = vld [vmem:[#allocation15] sm:$0xff] }
  0xde   : > { %1237 = vmatpush.bf16.msra.mxu1 %v1768_v28 }
  0xe3   : > { %v643_v42 = vpop.f32.mrf.mxu2  ;;  %v565_v48 = vpop.f32.mrf.mxu0 }
  0xe4   : > { %v648_v43 = vadd.f32 %v643_v42, %v599_v34  ;;  %v600_v49 = vpop.f32.mrf.mxu1 }
  0xe5   : > { %v601_v53 = vadd.f32 %v600_v49, %v565_v48 }
  0xe6   : > { %v654_v47 = vadd.f32 %v1897_v41, %v648_v43 }
  0xe8   : > { %v660_v50 = vmul.f32 %v1898_v44, %v654_v47  ;;  %v1073_v47 = vperm.slane %v1071_v31, 0 }
  0xea   : > { %v662_v52 = vmax.f32 %v660_v50, 0.0 }
  0xeb   : > { %v645_v54 = vpop.f32.mrf.mxu2 }
  0xec   : > { %v670_v55 = vmul.f32 %v1899_v51, %v662_v52  ;;  %v649_v56 = vadd.f32 %v645_v54, %v601_v53 }
  0xee   : > { %672 = vst [vmem:[#allocation3 + $0x1] sm:$0xff] %v670_v55  ;;  %v655_v57 = vadd.f32 %v1897_v41, %v649_v56 }
  0xf0   : > { %v661_v58 = vmul.f32 %v1898_v44, %v655_v57 }
  0xf2   : > { %v663_v59 = vmax.f32 %v661_v58, 0.0 }
  0xf4   : > { %v671_v60 = vmul.f32 %v1899_v51, %v663_v59 }
  0xf5   : > { %v674_v62 = vld [vmem:[#allocation3] sm:$0xff] }
  0xf6   : > { %673 = vst [vmem:[#allocation3 + $0x9] sm:$0xff] %v671_v60  ;;  %v695_v61 = vpack.c.bf16 %v671_v60, %v670_v55 }
  0xf8   : > { %801 = vmatmul.bf16.vlgmr.msra.gmra.mxu3 %v695_v61  ;;  %815 = vmatmul.bf16.vlgmr.msrb.gmra.mxu0 %v695_v61 }
  0xfd   : > { %v675_v63 = vld [vmem:[#allocation3 + $0x8] sm:$0xff] }
  0xfe   : > { %v676_v0 = vpack.c.bf16 %v675_v63, %v674_v62  ;;  %v929_v1 = vld [vmem:[#allocation3 + $0x2] sm:$0xff]  ;;  %v930_v2 = vld [vmem:[#allocation3 + $0xa] sm:$0xff] }
  0xff   : > { %v931_v3 = vpack.c.bf16 %v930_v2, %v929_v1 }
 0x100   : > { %909 = vmatmul.bf16.vlgmr.msrb.gmra.mxu1 %v676_v0  ;;  %923 = vmatmul.bf16.vlgmr.msrb.gmra.mxu2 %v676_v0 }
 0x108   : > { %1037 = vmatmul.bf16.vlgmr.msrb.gmra.mxu3 %v931_v3  ;;  %1051 = vmatmul.bf16.vlgmr.msra.gmra.mxu0 %v931_v3 }
 0x175   : > { %v816_v11 = vpop.f32.mrf.mxu0 }
 0x17b   : > { %v802_v15 = vpop.f32.mrf.mxu3 }
 0x17d   : > { %v818_v17 = vpop.f32.mrf.mxu0  ;;  %v910_v25 = vpop.f32.mrf.mxu1 }
 0x17e   : > { %v911_v34 = vadd.f32 %v910_v25, %v802_v15 }
 0x183   : > { %v924_v22 = vpop.f32.mrf.mxu2  ;;  %v804_v23 = vpop.f32.mrf.mxu3 }
 0x184   : > { %v925_v24 = vadd.f32 %v924_v22, %v816_v11 }
 0x185   : > { %v1052_v26 = vpop.f32.mrf.mxu0  ;;  %v912_v42 = vpop.f32.mrf.mxu1 }
 0x186   : > { %v1058_v29 = vadd.f32 %v1052_v26, %v925_v24  ;;  %v913_v45 = vadd.f32 %v912_v42, %v804_v23 }
 0x188   : > { %v1068_v36 = vadd.f32 %v1064_v30, %v1058_v29 }
 0x18a   : > { %v1078_v43 = vmul.f32 %v1074_v37, %v1068_v36 }
 0x18b   : > { %v926_v32 = vpop.f32.mrf.mxu2  ;;  %v1038_v33 = vpop.f32.mrf.mxu3 }
 0x18c   : > { %v927_v35 = vadd.f32 %v926_v32, %v818_v17  ;;  %v1057_v39 = vadd.f32 %v1038_v33, %v911_v34  ;;  %v1082_v50 = vmax.f32 %v1078_v43, 0.0 }
 0x18d   : > { %v1054_v38 = vpop.f32.mrf.mxu0 }
 0x18e   : > { %v1060_v41 = vadd.f32 %v1054_v38, %v927_v35  ;;  %v1067_v46 = vadd.f32 %v1063_v40, %v1057_v39 }
 0x190   : > { %v1070_v44 = vadd.f32 %v1064_v30, %v1060_v41  ;;  %v1077_v53 = vmul.f32 %v1073_v47, %v1067_v46 }
 0x192   : > { %v1080_v48 = vmul.f32 %v1074_v37, %v1070_v44  ;;  %v1081_v58 = vmax.f32 %v1077_v53, 0.0 }
 0x193   : > { %v1040_v49 = vpop.f32.mrf.mxu3 }
 0x194   : > { %v1084_v51 = vmax.f32 %v1080_v48, 0.0  ;;  %v1059_v52 = vadd.f32 %v1040_v49, %v913_v45 }
 0x196   : > { %v1092_v54 = vadd.f32 %v1084_v51, %v1082_v50  ;;  %v1069_v55 = vadd.f32 %v1063_v40, %v1059_v52 }
 0x198   : > { %v1093_v56 = vrot.slane %v1092_v54, 4  ;;  %v1079_v57 = vmul.f32 %v1073_v47, %v1069_v55 }
 0x19a   : > { %v1094_v59 = vadd.f32 %v1093_v56, %v1092_v54  ;;  %v1083_v60 = vmax.f32 %v1079_v57, 0.0 }
 0x19c   : > { %v1095_v61 = vrot.slane %v1094_v59, 2  ;;  %v1085_v62 = vadd.f32 %v1083_v60, %v1081_v58 }
 0x19e   : > { %v1086_v63 = vrot.slane %v1085_v62, 4  ;;  %v1096_v0 = vadd.f32 %v1095_v61, %v1094_v59 }
 0x1a0   : > { %v1087_v1 = vadd.f32 %v1086_v63, %v1085_v62  ;;  %v1097_v2 = vrot.slane %v1096_v0, 1 }
 0x1a2   : > { %v1088_v3 = vrot.slane %v1087_v1, 2  ;;  %v1098_v4 = vadd.f32 %v1097_v2, %v1096_v0 }
 0x1a4   : > { %v1100_v5 = vpack.c.bf16 %v1098_v4, %v1098_v4  ;;  %v1089_v6 = vadd.f32 %v1088_v3, %v1087_v1 }
 0x1a6   : > { %1251 = vmatmul.bf16.vlgmr.msra.gmra.mxu2 %v1100_v5  ;;  %v1090_v7 = vrot.slane %v1089_v6, 1 }
 0x1a8   : > { %v1091_v8 = vadd.f32 %v1090_v7, %v1089_v6 }
 0x1aa   : > { %v1099_v9 = vpack.c.bf16 %v1091_v8, %v1091_v8 }
 0x1ac   : > { %1238 = vmatmul.bf16.vlgmr.msra.gmra.mxu1 %v1099_v9 }
 0x229   : > { %v1239_v11 = vpop.f32.mrf.mxu1  ;;  %v1252_v12 = vpop.f32.mrf.mxu2 }
 0x22a   : > { %v1240_v13 = vadd.f32 %v1239_v11, %v1133_v10 }
 0x22c   : > { %v1253_v14 = vadd.f32 %v1252_v12, %v1240_v13 }
 0x22e   : > { %1256 = vst [vmem:[%s498_s13] sm:$0x1] %v1253_v14 }
 0x22f   : > { %2137 = shalt.err (!%p2134_p9)
}
 0x230   : > { %1810 = dma.vmem_to_hbm [thread:$0]  (%p2367_p4), %s1269_s5, 16, %s1271_s9, %s1258_s23  }
 0x231   : > { %v1241_v15 = vpop.f32.mrf.mxu1  ;;  %v1254_v16 = vpop.f32.mrf.mxu2 }
 0x232 PF: > { %s1282_s14 = sand.u32 1, %s2176_s17   ;;  %p2507_p10 = scmp.ge.s32.totalorder %s2188_s20, 2 }
 0x233   : > { %s1283_s16 = scalar_lea.sflag [#allocation6], %s1282_s14 }
 0x234   : > { %p1836_p13 = pnand %p2507_p10, %p2371_p6 }
 0x236   : > { %p1837_p11 = pneg %p1836_p13 }
 0x238   : > { %2171 = dma.done.wait (%p1837_p11), %s1283_s16, 16  }
 0x239   : > { %2173 = vsyncadd (%p1837_p11), %s1283_s16, 4294967280  ;;  %p27_p4 = scmp.ge.s32.totalorder %s2341_s21, 4   ;;  %s2508_s17 = smov %s2180_s18 }
 0x23a   : > { %s2509_s18 = smov %s2184_s19  ;;  %s2510_s19 = smov %s2352_s28 }
 0x23b   : > { %s2511_s20 = smov %s2341_s21  ;;  %29 = sbr.rel (!%p27_p4) target bundleno = 15 (0xf), region = 137 }
 0x240   :  { %1288 = vsyncpa [#allocation5], 1 }
 0x241   :  { %1290 = vsyncpa [#allocation5 + $0x1], 1 }
 0x242   :  { %1291 = vsyncpa [#allocation8], 1 }
 0x243   :  { %1292 = vsyncpa [#allocation11], 1 }
 0x244   :  { %1293 = vsyncpa [#allocation14], 1 }
 0x245   :  { %1294 = vsyncpa [#allocation6], 1 }
 0x246   :  { %1296 = vsyncpa [#allocation6 + $0x1], 1 }

</bundles_post_ra>
